<compile_context>
chip_gen: v6e
topology: v6e:2x2x1
jax: 0.10.0
libtpu: 0.0.40
codegen_flags: <defaults>
</compile_context>

<pallas_src>
import jax
import jax.numpy as jnp
from jax import lax
from jax.experimental import pallas as pl
from jax.experimental.pallas import tpu as pltpu


def _mlp_kernel(ob_ref, nob_ref,
                w1a_ref, w1b_ref, b1_ref,
                w2_ref, b2_ref,
                w3_ref, b3_ref,
                out_ref):
    # Layer 1: split matmul replaces cat([ob, nob], axis=1) @ W1.
    h1 = jnp.dot(ob_ref[...], w1a_ref[...],
                 preferred_element_type=jnp.float32,
                 precision=lax.Precision.HIGHEST)
    h1 = h1 + jnp.dot(nob_ref[...], w1b_ref[...],
                      preferred_element_type=jnp.float32,
                      precision=lax.Precision.HIGHEST)
    h1 = jnp.maximum(h1 + b1_ref[...], 0.0)                       # (TB, 32) f32

    # Layer 2
    h2 = jnp.dot(h1, w2_ref[...],
                 preferred_element_type=jnp.float32,
                 precision=lax.Precision.HIGHEST)
    h2 = jnp.maximum(h2 + b2_ref[...], 0.0)                       # (TB, 64) f32

    # Layer 3 (no activation)
    y = jnp.dot(h2, w3_ref[...],
                preferred_element_type=jnp.float32,
                precision=lax.Precision.HIGHEST)
    out_ref[...] = (y + b3_ref[...]).astype(out_ref.dtype)        # (TB, A)


def _round_up(x, m):
    return ((x + m - 1) // m) * m


def _device_tile_caps():
    """Generation-specific batch-tile cap + 'has 2 TensorCores' flag."""
    try:
        kind = jax.devices()[0].device_kind.lower()
    except Exception:
        kind = ""
    is_v5e = ("v5 lite" in kind) or ("v5e" in kind) or ("v5litepod" in kind)
    is_v7 = "v7" in kind
    # Lane-padded double-buffered footprint: TB=8192 f32 ~= 24 MB (fits 32 MiB
    # scoped default on v6e/v7x); v5e's 16 MiB scoped default -> TB=4096.
    cap = 4096 if is_v5e else 8192
    return cap, is_v7


def con_inverse_dynamic_model(ob_emb, next_ob_emb, params, *, tb=None):
    """Fused forward pass of ConInverseDynamicModel.

    ob_emb, next_ob_emb : (B, E) float32 or bfloat16 (same dtype)
    params : dict with
        w1 (2E, 32), b1 (1, 32), w2 (32, 64), b2 (1, 64),
        w3 (64, A),  b3 (1, A)   -- weights in (in, out) layout,
                                    biases as (1, N) rows.
    tb : batch tile size (rows per grid step); None -> auto (per-gen cap).
    """
    B, E = ob_emb.shape
    A = params["w3"].shape[1]
    act_dtype = ob_emb.dtype
    act_itemsize = jnp.dtype(act_dtype).itemsize

    # Split W1 so the kernel never concatenates along the lane axis; cast the
    # (tiny, <20 KB) weights to the activation dtype so the MXU sees one dtype.
    w1a = params["w1"][:E, :].astype(act_dtype)
    w1b = params["w1"][E:, :].astype(act_dtype)
    w2 = params["w2"].astype(act_dtype)
    w3 = params["w3"].astype(act_dtype)
    b1 = params["b1"].astype(jnp.float32)
    b2 = params["b2"].astype(jnp.float32)
    b3 = params["b3"].astype(jnp.float32)

    cap, is_v7 = _device_tile_caps()

    # --- batch tile selection (no padding; ragged last block is clipped) ----
    if tb is None:
        tb = cap
    if B <= tb:
        if is_v7 and B >= 16:
            # Split single-tile batches in two so ("parallel",) feeds both
            # v7x TensorCores instead of leaving one idle.
            tb_eff = _round_up(pl.cdiv(B, 2), 8)
        else:
            tb_eff = B          # block == full array dim: no 8-alignment needed
    else:
        tb_eff = _round_up(tb, 8)

    grid = (pl.cdiv(B, tb_eff),)

    def batch_map(i):
        return (i, 0)

    def const_map(i):
        return (0, 0)

    in_specs = [
        pl.BlockSpec((tb_eff, E), batch_map),          # ob_emb
        pl.BlockSpec((tb_eff, E), batch_map),          # next_ob_emb
        pl.BlockSpec(w1a.shape, const_map),            # W1a  (E, 32)
        pl.BlockSpec(w1b.shape, const_map),            # W1b  (E, 32)
        pl.BlockSpec(b1.shape, const_map),             # b1   (1, 32)
        pl.BlockSpec(w2.shape, const_map),             # W2   (32, 64)
        pl.BlockSpec(b2.shape, const_map),             # b2   (1, 64)
        pl.BlockSpec(w3.shape, const_map),             # W3   (64, A)
        pl.BlockSpec(b3.shape, const_map),             # b3   (1, A)
    ]
    out_spec = pl.BlockSpec((tb_eff, A), batch_map)

    # Advisory cost estimate so XLA schedules/overlaps this call sensibly.
    flops = 2 * B * (2 * E * 32 + 32 * 64 + 64 * A)
    weight_bytes = sum(int(x.size) * jnp.dtype(x.dtype).itemsize
                       for x in (w1a, w1b, w2, w3, b1, b2, b3))
    bytes_accessed = B * (2 * E * act_itemsize + A * 4) + weight_bytes

    return pl.pallas_call(
        _mlp_kernel,
        out_shape=jax.ShapeDtypeStruct((B, A), jnp.float32),
        grid=grid,
        in_specs=in_specs,
        out_specs=out_spec,
        compiler_params=pltpu.CompilerParams(
            dimension_semantics=("parallel",)),
        cost_estimate=pl.CostEstimate(
            flops=flops, transcendentals=0, bytes_accessed=bytes_accessed),
    )(ob_emb, next_ob_emb, w1a, w1b, b1, w2, b2, w3, b3)


def _reference(ob_emb, next_ob_emb, params):
    """Pure-JAX reference (HIGHEST precision to match the kernel's dots)."""
    x = jnp.concatenate([ob_emb, next_ob_emb], axis=1).astype(jnp.float32)
    h1 = jax.nn.relu(jnp.dot(x, params["w1"],
                             precision=lax.Precision.HIGHEST) + params["b1"][0])
    h2 = jax.nn.relu(jnp.dot(h1, params["w2"],
                             precision=lax.Precision.HIGHEST) + params["b2"][0])
    return jnp.dot(h2, params["w3"],
                   precision=lax.Precision.HIGHEST) + params["b3"][0]


def _init_params(key, embedding_size, action_shape):
    """Deterministic synthetic init (shapes follow the nn.Sequential in __init__).

    Weights in (in, out) layout; biases pre-stored as (1, N) rows.
    """
    k1, k2, k3, k4, k5, k6 = jax.random.split(key, 6)
    in0 = embedding_size * 2
    return {
        "w1": jax.random.normal(k1, (in0, 32), jnp.float32) * 0.1,
        "b1": jax.random.normal(k2, (1, 32), jnp.float32) * 0.1,
        "w2": jax.random.normal(k3, (32, 64), jnp.float32) * 0.1,
        "b2": jax.random.normal(k4, (1, 64), jnp.float32) * 0.1,
        "w3": jax.random.normal(k5, (64, action_shape), jnp.float32) * 0.1,
        "b3": jax.random.normal(k6, (1, action_shape), jnp.float32) * 0.1,
    }


if __name__ == "__main__":
    E = 32               # embedding_size
    A = 6                # action_shape

    key = jax.random.PRNGKey(0)
    k_ob, k_nob, k_p = jax.random.split(key, 3)
    params = _init_params(k_p, E, A)

    # Case 1: small batch, single tile (block == full array).
    B = 8
    ob_emb = jax.random.normal(k_ob, (B, E), jnp.float32)
    next_ob_emb = jax.random.normal(k_nob, (B, E), jnp.float32)
    pred = jax.block_until_ready(
        con_inverse_dynamic_model(ob_emb, next_ob_emb, params))
    ref = _reference(ob_emb, next_ob_emb, params)
    assert pred.shape == (B, A)
    assert jnp.allclose(pred, ref, atol=1e-4, rtol=1e-4)

    # Case 2: explicit small tile, B % tb != 0 -> exercises the no-pad /
    # clipped-last-block path (grid=4, last block has 8 valid rows).
    B2 = 200
    ob2 = jax.random.normal(jax.random.fold_in(k_ob, 1), (B2, E), jnp.float32)
    nob2 = jax.random.normal(jax.random.fold_in(k_nob, 1), (B2, E), jnp.float32)
    pred2 = jax.block_until_ready(
        con_inverse_dynamic_model(ob2, nob2, params, tb=64))
    ref2 = _reference(ob2, nob2, params)
    assert pred2.shape == (B2, A)
    assert jnp.allclose(pred2, ref2, atol=1e-4, rtol=1e-4)

    # Case 3: auto tile selection, odd batch (splits across both TCs on v7x).
    B3 = 50
    ob3 = jax.random.normal(jax.random.fold_in(k_ob, 2), (B3, E), jnp.float32)
    nob3 = jax.random.normal(jax.random.fold_in(k_nob, 2), (B3, E), jnp.float32)
    pred3 = jax.block_until_ready(
        con_inverse_dynamic_model(ob3, nob3, params))
    ref3 = _reference(ob3, nob3, params)
    assert pred3.shape == (B3, A)
    assert jnp.allclose(pred3, ref3, atol=1e-4, rtol=1e-4)

    # Case 4: bf16 activations (how a bandwidth-conscious producer should feed
    # this kernel).  Compare against the f32 reference on the bf16-cast values.
    ob4 = ob2.astype(jnp.bfloat16)
    nob4 = nob2.astype(jnp.bfloat16)
    pred4 = jax.block_until_ready(
        con_inverse_dynamic_model(ob4, nob4, params, tb=128))
    params_cast = {k: (v.astype(jnp.bfloat16).astype(jnp.float32)
                       if k.startswith("w") else v) for k, v in params.items()}
    ref4 = _reference(ob4.astype(jnp.float32), nob4.astype(jnp.float32),
                      params_cast)
    assert pred4.shape == (B2, A)
    assert jnp.allclose(pred4, ref4, atol=2e-2, rtol=2e-2)

    print("KERNEL_OK")
</pallas_src>

<mosaic_0001>
module attributes {stable_mosaic.version = 11 : i64} {
  func.func @_mlp_kernel(%arg0: i32, %arg1: memref<8x32xf32, #tpu.memory_space<vmem>>, %arg2: memref<8x32xf32, #tpu.memory_space<vmem>>, %arg3: memref<32x32xf32, #tpu.memory_space<vmem>>, %arg4: memref<32x32xf32, #tpu.memory_space<vmem>>, %arg5: memref<1x32xf32, #tpu.memory_space<vmem>>, %arg6: memref<32x64xf32, #tpu.memory_space<vmem>>, %arg7: memref<1x64xf32, #tpu.memory_space<vmem>>, %arg8: memref<64x6xf32, #tpu.memory_space<vmem>>, %arg9: memref<1x6xf32, #tpu.memory_space<vmem>>, %arg10: memref<8x6xf32, #tpu.memory_space<vmem>>) attributes {dimension_semantics = [#tpu.dimension_semantics<parallel>], iteration_bounds = array<i64: 1>, scalar_prefetch = 0 : i64, scratch_operands = 0 : i64, tpu.core_type = #tpu.core_type<tc>, window_params = [{transform_indices = @transform_0, window_bounds = array<i64: 8, 32>}, {transform_indices = @transform_1, window_bounds = array<i64: 8, 32>}, {pipeline_mode = #tpu.pipeline_mode<synchronous>, transform_indices = @transform_2, window_bounds = array<i64: 32, 32>}, {pipeline_mode = #tpu.pipeline_mode<synchronous>, transform_indices = @transform_3, window_bounds = array<i64: 32, 32>}, {pipeline_mode = #tpu.pipeline_mode<synchronous>, transform_indices = @transform_4, window_bounds = array<i64: 1, 32>}, {pipeline_mode = #tpu.pipeline_mode<synchronous>, transform_indices = @transform_5, window_bounds = array<i64: 32, 64>}, {pipeline_mode = #tpu.pipeline_mode<synchronous>, transform_indices = @transform_6, window_bounds = array<i64: 1, 64>}, {pipeline_mode = #tpu.pipeline_mode<synchronous>, transform_indices = @transform_7, window_bounds = array<i64: 64, 6>}, {pipeline_mode = #tpu.pipeline_mode<synchronous>, transform_indices = @transform_8, window_bounds = array<i64: 1, 6>}, {transform_indices = @transform_9, window_bounds = array<i64: 8, 6>}]} {
    %c0 = arith.constant 0 : index
    %c0_0 = arith.constant 0 : index
    %0 = vector.load %arg1[%c0, %c0_0] : memref<8x32xf32, #tpu.memory_space<vmem>>, vector<8x32xf32>
    %c0_1 = arith.constant 0 : index
    %c0_2 = arith.constant 0 : index
    %1 = vector.load %arg3[%c0_1, %c0_2] : memref<32x32xf32, #tpu.memory_space<vmem>>, vector<32x32xf32>
    %cst = arith.constant dense<0.000000e+00> : vector<8x32xf32>
    %2 = tpu.matmul %0, %1, %cst {dimension_numbers = #tpu.dot_dimension_numbers<[1], [0], [0], [1], [0, 0, 1, 1], [], []>, precision = #tpu.contract_precision<fp32>} : vector<8x32xf32>, vector<32x32xf32>, vector<8x32xf32> -> vector<8x32xf32>
    %c0_3 = arith.constant 0 : index
    %c0_4 = arith.constant 0 : index
    %3 = vector.load %arg2[%c0_3, %c0_4] : memref<8x32xf32, #tpu.memory_space<vmem>>, vector<8x32xf32>
    %c0_5 = arith.constant 0 : index
    %c0_6 = arith.constant 0 : index
    %4 = vector.load %arg4[%c0_5, %c0_6] : memref<32x32xf32, #tpu.memory_space<vmem>>, vector<32x32xf32>
    %cst_7 = arith.constant dense<0.000000e+00> : vector<8x32xf32>
    %5 = tpu.matmul %3, %4, %cst_7 {dimension_numbers = #tpu.dot_dimension_numbers<[1], [0], [0], [1], [0, 0, 1, 1], [], []>, precision = #tpu.contract_precision<fp32>} : vector<8x32xf32>, vector<32x32xf32>, vector<8x32xf32> -> vector<8x32xf32>
    %6 = arith.addf %2, %5 : vector<8x32xf32>
    %c0_8 = arith.constant 0 : index
    %c0_9 = arith.constant 0 : index
    %7 = vector.load %arg5[%c0_8, %c0_9] : memref<1x32xf32, #tpu.memory_space<vmem>>, vector<1x32xf32>
    %8 = vector.broadcast %7 : vector<1x32xf32> to vector<8x32xf32>
    %9 = arith.addf %6, %8 : vector<8x32xf32>
    %cst_10 = arith.constant 0.000000e+00 : f32
    %10 = vector.broadcast %cst_10 : f32 to vector<8x32xf32>
    %11 = arith.maximumf %9, %10 : vector<8x32xf32>
    %c0_11 = arith.constant 0 : index
    %c0_12 = arith.constant 0 : index
    %12 = vector.load %arg6[%c0_11, %c0_12] : memref<32x64xf32, #tpu.memory_space<vmem>>, vector<32x64xf32>
    %cst_13 = arith.constant dense<0.000000e+00> : vector<8x64xf32>
    %13 = tpu.matmul %11, %12, %cst_13 {dimension_numbers = #tpu.dot_dimension_numbers<[1], [0], [0], [1], [0, 0, 1, 1], [], []>, precision = #tpu.contract_precision<fp32>} : vector<8x32xf32>, vector<32x64xf32>, vector<8x64xf32> -> vector<8x64xf32>
    %c0_14 = arith.constant 0 : index
    %c0_15 = arith.constant 0 : index
    %14 = vector.load %arg7[%c0_14, %c0_15] : memref<1x64xf32, #tpu.memory_space<vmem>>, vector<1x64xf32>
    %15 = vector.broadcast %14 : vector<1x64xf32> to vector<8x64xf32>
    %16 = arith.addf %13, %15 : vector<8x64xf32>
    %cst_16 = arith.constant 0.000000e+00 : f32
    %17 = vector.broadcast %cst_16 : f32 to vector<8x64xf32>
    %18 = arith.maximumf %16, %17 : vector<8x64xf32>
    %c0_17 = arith.constant 0 : index
    %c0_18 = arith.constant 0 : index
    %19 = vector.load %arg8[%c0_17, %c0_18] : memref<64x6xf32, #tpu.memory_space<vmem>>, vector<64x6xf32>
    %cst_19 = arith.constant dense<0.000000e+00> : vector<8x6xf32>
    %20 = tpu.matmul %18, %19, %cst_19 {dimension_numbers = #tpu.dot_dimension_numbers<[1], [0], [0], [1], [0, 0, 1, 1], [], []>, precision = #tpu.contract_precision<fp32>} : vector<8x64xf32>, vector<64x6xf32>, vector<8x6xf32> -> vector<8x6xf32>
    %c0_20 = arith.constant 0 : index
    %c0_21 = arith.constant 0 : index
    %21 = vector.load %arg9[%c0_20, %c0_21] : memref<1x6xf32, #tpu.memory_space<vmem>>, vector<1x6xf32>
    %22 = vector.broadcast %21 : vector<1x6xf32> to vector<8x6xf32>
    %23 = arith.addf %20, %22 : vector<8x6xf32>
    %c0_22 = arith.constant 0 : index
    %c0_23 = arith.constant 0 : index
    %24 = vector.load %arg10[%c0_22, %c0_23] : memref<8x6xf32, #tpu.memory_space<vmem>>, vector<8x6xf32>
    tpu.vector_store %arg10[%c0_22, %c0_23], %23 {strides = array<i32>} : memref<8x6xf32, #tpu.memory_space<vmem>>, vector<8x6xf32>,
    return
  }
  func.func @transform_0(%arg0: i32) -> (i32, i32) {
    %c0_i32 = arith.constant 0 : i32
    %c0_i32_0 = arith.constant 0 : i32
    return %arg0, %c0_i32 : i32, i32
  }
  func.func @transform_1(%arg0: i32) -> (i32, i32) {
    %c0_i32 = arith.constant 0 : i32
    %c0_i32_0 = arith.constant 0 : i32
    return %arg0, %c0_i32 : i32, i32
  }
  func.func @transform_2(%arg0: i32) -> (i32, i32) {
    %c0_i32 = arith.constant 0 : i32
    %c0_i32_0 = arith.constant 0 : i32
    %c0_i32_1 = arith.constant 0 : i32
    return %c0_i32, %c0_i32_0 : i32, i32
  }
  func.func @transform_3(%arg0: i32) -> (i32, i32) {
    %c0_i32 = arith.constant 0 : i32
    %c0_i32_0 = arith.constant 0 : i32
    %c0_i32_1 = arith.constant 0 : i32
    return %c0_i32, %c0_i32_0 : i32, i32
  }
  func.func @transform_4(%arg0: i32) -> (i32, i32) {
    %c0_i32 = arith.constant 0 : i32
    %c0_i32_0 = arith.constant 0 : i32
    %c0_i32_1 = arith.constant 0 : i32
    return %c0_i32, %c0_i32_0 : i32, i32
  }
  func.func @transform_5(%arg0: i32) -> (i32, i32) {
    %c0_i32 = arith.constant 0 : i32
    %c0_i32_0 = arith.constant 0 : i32
    %c0_i32_1 = arith.constant 0 : i32
    return %c0_i32, %c0_i32_0 : i32, i32
  }
  func.func @transform_6(%arg0: i32) -> (i32, i32) {
    %c0_i32 = arith.constant 0 : i32
    %c0_i32_0 = arith.constant 0 : i32
    %c0_i32_1 = arith.constant 0 : i32
    return %c0_i32, %c0_i32_0 : i32, i32
  }
  func.func @transform_7(%arg0: i32) -> (i32, i32) {
    %c0_i32 = arith.constant 0 : i32
    %c0_i32_0 = arith.constant 0 : i32
    %c0_i32_1 = arith.constant 0 : i32
    return %c0_i32, %c0_i32_0 : i32, i32
  }
  func.func @transform_8(%arg0: i32) -> (i32, i32) {
    %c0_i32 = arith.constant 0 : i32
    %c0_i32_0 = arith.constant 0 : i32
    %c0_i32_1 = arith.constant 0 : i32
    return %c0_i32, %c0_i32_0 : i32, i32
  }
  func.func @transform_9(%arg0: i32) -> (i32, i32) {
    %c0_i32 = arith.constant 0 : i32
    %c0_i32_0 = arith.constant 0 : i32
    return %arg0, %c0_i32 : i32, i32
  }
}

</mosaic_0001>

<bundles_post_ra>
// kernel: tpu_custom_call.1
= control target key start
LH: loop header
LB: loop body
LE: loop exit
PB: predicated region body
PF: predicated region fallthrough
CT: control target
= control target key end

     0   :  { %14 = vsyncpa [#allocation3], 0  ;;  %s3256_s0 = inlined_call_operand.vmem [shape: f32[8,32], index: 0, kind: input, shape index: {}]   ;;  %s3257_s1 = inlined_call_operand.hbm [shape: f32[8,32], index: 1, kind: input, shape index: {}]   ;;  %s3258_s2 = inlined_call_operand.vmem [shape: f32[32,32], index: 2, kind: input, shape index: {}]   ;;  %s3259_s3 = inlined_call_operand.vmem [shape: f32[32,32], index: 3, kind: input, shape index: {}]   ;;  %s3260_s4 = inlined_call_operand.vmem [shape: f32[1,32], index: 4, kind: input, shape index: {}]   ;;  %s3261_s5 = inlined_call_operand.hbm [shape: f32[32,64], index: 5, kind: input, shape index: {}]   ;;  %s3262_s6 = inlined_call_operand.vmem [shape: f32[1,64], index: 6, kind: input, shape index: {}]   ;;  %s3263_s7 = inlined_call_operand.vmem [shape: f32[64,6], index: 7, kind: input, shape index: {}]   ;;  %s3264_s8 = inlined_call_operand.vmem [shape: f32[1,6], index: 8, kind: input, shape index: {}]   ;;  %s3265_s9 = inlined_call_operand.hbm [shape: f32[8,6], index: 9, kind: output, shape index: {}]  }
   0x1   :  { %15 = vsyncpa [#allocation6], 0 }
   0x2   :  { %16 = vsyncpa [#allocation4], 0  ;;  %s2661_s30 = smov [#allocation2]   ;;  %s2662_s11 = smov [#allocation5]  }
   0x3   :  { %s25_s10 = sshll.u32 %s2661_s30, 4  ;;  %s40_s12 = sshll.u32 %s2662_s11, 4  ;;  %s26_s10 = int_to_ptr.vmem [resolvable:$true] %s25_s10  ;;  %s41_s12 = int_to_ptr.vmem [resolvable:$true] %s40_s12 }
   0x4   :  { %s2603_s13 = scalar_lea.vmem %s26_s10, 128  ;;  %p2608_p1 = scmp.lt.s32.totalorder %s26_s10, %s26_s10 }
   0x5   :  { %p2604_p0 = scmp.ne.s32.totalorder %s26_s10, %s2603_s13  ;;  %p2609_p2 = scmp.lt.s32.totalorder %s2603_s13, %s2603_s13 }
   0x7   :  { %p2610_p3 = por %p2609_p2, %p2608_p1 }
   0x9   :  { %p2611_p4 = pnand %p2610_p3, %p2604_p0 }
   0xb   :  { %2614 = shalt.err (!%p2611_p4)
}
   0xc   :  { %28 = dma.hbm_to_vmem [thread:$0]  %s3257_s1, 128, %s26_s10, [#allocation3]  }
   0xd   :  { %s2623_s16 = scalar_lea.vmem %s41_s12, 512  ;;  %p2628_p6 = scmp.lt.s32.totalorder %s41_s12, %s41_s12 }
   0xe   :  { %p2624_p5 = scmp.ne.s32.totalorder %s41_s12, %s2623_s16  ;;  %p2629_p7 = scmp.lt.s32.totalorder %s2623_s16, %s2623_s16 }
  0x10   :  { %p2630_p8 = por %p2629_p7, %p2628_p6 }
  0x12   :  { %p2631_p9 = pnand %p2630_p8, %p2624_p5 }
  0x14   :  { %2634 = shalt.err (!%p2631_p9)
}
  0x15   :  { %s2663_s17 = smov 128   ;;  %s2664_s18 = smov 8  }
  0x16   :  { %46 = dma.hbm_to_vmem [thread:$0]  %s3261_s5, 512, %s41_s12, [#allocation6], %s2663_s17, %s2663_s17, %s2664_s18  }
  0x17   :  { %2655 = dma.done.wait [#allocation3], 128  }
  0x18   :  { %2656 = vsyncadd [#allocation3], 4294967168 }
  0x19   :  { %2657 = dma.done.wait [#allocation6], 512  }
  0x1a   :  { %2658 = vsyncadd [#allocation6], 4294966784  ;;  %v2665_v0 = vmov 0.0   ;;  %vm2666_vm0 = vmmov 0   ;;  %vm69_vm1 = vcmask 261120   ;;  %v68_v1 = vld [vmem:[%s3259_s3 + $0x18] sm:$0xff] }
  0x1b   :  { %2276 = vmatprep.subr.mxu0 %v2665_v0  ;;  %2287 = vmatprep.subr.mxu1 %v2665_v0  ;;  %v67_v2 = vld [vmem:[%s3259_s3 + $0x10] sm:$0xff]  ;;  %v66_v3 = vld [vmem:[%s3259_s3 + $0x8] sm:$0xff]  ;;  %v2739_v4 = vand.u32 4294901760, %v68_v1  ;;  %v65_v7 = vld [vmem:[%s3259_s3] sm:$0xff]  ;;  %vm1570_vm2 = vcmask 523264   ;;  %s2667_s29 = smov [#allocation7]  }
  0x1c   :  { %2284 = vmatprep.mubr.msk.f32.mxu0 %vm2666_vm0, %v2665_v0  ;;  %2295 = vmatprep.mubr.msk.f32.mxu1 %vm2666_vm0, %v2665_v0  ;;  %v2741_v5 = vand.u32 4294901760, %v67_v2  ;;  %v2743_v6 = vand.u32 4294901760, %v66_v3  ;;  %v64_v8 = vld [vmem:[#allocation2] sm:$0xff]  ;;  %v2748_v9 = vand.u32 4294901760, %v65_v7  ;;  %v63_v33 = vld [vmem:[%s3258_s2 + $0x18] sm:$0xff]  ;;  %v62_v35 = vld [vmem:[%s3258_s2 + $0x10] sm:$0xff] }
  0x1d   :  { %v71_v10 = vsel %vm69_vm1, %v64_v8, 0  ;;  %2277 = vmatpush3.msra.mxu0 %v2739_v4  ;;  %v178_v11 = vsub.f32 %v68_v1, %v2739_v4  ;;  %v59_v32 = vld [vmem:[%s3256_s0] sm:$0xff]  ;;  %v2806_v36 = vand.u32 4294901760, %v63_v33  ;;  %v61_v38 = vld [vmem:[%s3258_s2 + $0x8] sm:$0xff]  ;;  %v2816_v39 = vand.u32 4294901760, %v62_v35  ;;  %s2119_s0 = sshll.u32 %s2667_s29, 4  ;;  %s2120_s0 = int_to_ptr.vmem [resolvable:$true] %s2119_s0 }
  0x1e   :  { %v2753_v12 = vand.u32 4294901760, %v71_v10  ;;  %v185_v13 = vsub.f32 %v67_v2, %v2741_v5  ;;  %v2757_v14 = vsub.f32 %v66_v3, %v2743_v6  ;;  %2278 = vmatprep.subr.mxu0 %v2665_v0  ;;  %v2761_v15 = vsub.f32 %v65_v7, %v2748_v9  ;;  %v60_v40 = vld [vmem:[%s3258_s2] sm:$0xff]  ;;  %v1057_v2 = vld [vmem:[#allocation5 + $0x10] sm:$0xff]  ;;  %s2635_s30 = scalar_lea.vmem %s2120_s0, 128  ;;  %p2640_p11 = scmp.lt.s32.totalorder %s2120_s0, %s2120_s0 }
  0x1f   :  { %2279 = vmatpush3.msra.mxu0 %v2741_v5  ;;  %v179_v16 = vand.u32 4294901760, %v178_v11  ;;  %v559_v34 = vsel %vm69_vm1, %v59_v32, 0  ;;  %v2825_v41 = vsub.f32 %v63_v33, %v2806_v36  ;;  %v2827_v42 = vand.u32 4294901760, %v61_v38  ;;  %v1058_v63 = vld [vmem:[#allocation5 + $0x18] sm:$0xff]  ;;  %p2636_p10 = scmp.ne.s32.totalorder %s2120_s0, %s2635_s30  ;;  %p2641_p12 = scmp.lt.s32.totalorder %s2635_s30, %s2635_s30 }
  0x20   :  { %v2765_v17 = vsub.f32 %v71_v10, %v2753_v12  ;;  %v186_v18 = vand.u32 4294901760, %v185_v13  ;;  %v193_v19 = vand.u32 4294901760, %v2757_v14  ;;  %2280 = vmatprep.subr.mxu0 %v2665_v0  ;;  %v200_v20 = vand.u32 4294901760, %v2761_v15 }
  0x21   :  { %2281 = vmatpush3.msra.mxu0 %v2743_v6  ;;  %v180_v21 = vsub.f32 %v178_v11, %v179_v16  ;;  %v2808_v37 = vand.u32 4294901760, %v559_v34  ;;  %v2838_v44 = vsub.f32 %v62_v35, %v2816_v39  ;;  %v2840_v45 = vand.u32 4294901760, %v60_v40  ;;  %p2642_p13 = por %p2641_p12, %p2640_p11 }
  0x22   :  { %v144_v22 = vand.u32 4294901760, %v2765_v17  ;;  %v187_v23 = vsub.f32 %v185_v13, %v186_v18  ;;  %v194_v24 = vsub.f32 %v2757_v14, %v193_v19  ;;  %2282 = vmatprep.subr.mxu0 %v2665_v0  ;;  %v201_v28 = vsub.f32 %v2761_v15, %v200_v20 }
  0x23   :  { %2283 = vmatpush3.msra.mxu0 %v2748_v9  ;;  %v181_v25 = vand.u32 4294901760, %v180_v21  ;;  %v2830_v43 = vsub.f32 %v559_v34, %v2808_v37  ;;  %v2847_v46 = vsub.f32 %v61_v38, %v2827_v42  ;;  %v667_v47 = vand.u32 4294901760, %v2825_v41  ;;  %p2643_p0 = pnand %p2642_p13, %p2636_p10 }
  0x24   :  { %v145_v26 = vsub.f32 %v2765_v17, %v144_v22  ;;  %v188_v27 = vand.u32 4294901760, %v187_v23  ;;  %2298 = vmatprep.subr.mxu0 %v2665_v0  ;;  %v195_v30 = vand.u32 4294901760, %v194_v24  ;;  %v202_v31 = vand.u32 4294901760, %v201_v28 }
  0x25   :  { %2288 = vmatpush3.msra.mxu1 %v181_v25  ;;  %v632_v48 = vand.u32 4294901760, %v2830_v43  ;;  %v2858_v49 = vsub.f32 %v60_v40, %v2840_v45  ;;  %v674_v50 = vand.u32 4294901760, %v2838_v44  ;;  %v668_v51 = vsub.f32 %v2825_v41, %v667_v47 }
  0x26   :  { %v146_v29 = vand.u32 4294901760, %v145_v26  ;;  %2289 = vmatprep.subr.mxu1 %v2665_v0  ;;  %v681_v53 = vand.u32 4294901760, %v2847_v46  ;;  %v2943_v1 = vand.u32 4294901760, %v1058_v63  ;;  %vm2111_vm3 = vcmask 48128  }
  0x27   :  { %2290 = vmatpush3.msra.mxu1 %v188_v27  ;;  %v633_v52 = vsub.f32 %v2830_v43, %v632_v48  ;;  %v675_v54 = vsub.f32 %v2838_v44, %v674_v50  ;;  %v688_v55 = vand.u32 4294901760, %v2858_v49  ;;  %v669_v56 = vand.u32 4294901760, %v668_v51 }
  0x28   :  { %2285 = vmatmul.mubr.f32.vlgmr.msra.gmra.mxu0 %v146_v29  ;;  %2291 = vmatprep.subr.mxu1 %v2665_v0  ;;  %v682_v58 = vsub.f32 %v2847_v46, %v681_v53  ;;  %v2946_v3 = vsub.f32 %v1058_v63, %v2943_v1 }
  0x29   :  { %2299 = vmatpush3.msra.mxu0 %v178_v11  ;;  %2292 = vmatpush3.msra.mxu1 %v195_v30  ;;  %v634_v57 = vand.u32 4294901760, %v633_v52  ;;  %v676_v59 = vand.u32 4294901760, %v675_v54  ;;  %v689_v60 = vsub.f32 %v2858_v49, %v688_v55 }
  0x2a   :  { %2300 = vmatprep.subr.mxu0 %v2665_v0  ;;  %2293 = vmatprep.subr.mxu1 %v2665_v0  ;;  %v683_v61 = vand.u32 4294901760, %v682_v58 }
  0x2b   :  { %2301 = vmatpush3.msra.mxu0 %v185_v13  ;;  %2294 = vmatpush3.msra.mxu1 %v202_v31  ;;  %v690_v62 = vand.u32 4294901760, %v689_v60 }
  0x2c   :  { %2302 = vmatprep.subr.mxu0 %v2665_v0  ;;  %2296 = vmatmul.mubr.f32.vlgmr.msra.gmra.mxu1 %v2753_v12 }
  0x2d   :  { %2303 = vmatpush3.msra.mxu0 %v2757_v14  ;;  %2309 = vmatprep.subr.mxu1 %v2665_v0 }
  0x2e   :  { %2304 = vmatprep.subr.mxu0 %v2665_v0  ;;  %2306 = vmatprep.mubr.msk.f32.mxu0 %vm2666_vm0, %v2665_v0 }
  0x2f   :  { %2305 = vmatpush3.msra.mxu0 %v2761_v15  ;;  %2310 = vmatpush3.msra.mxu1 %v2739_v4 }
  0x30   :  { %2307 = vmatmul.mubr.f32.vlgmr.msra.gmra.mxu0 %v2765_v17  ;;  %2311 = vmatprep.subr.mxu1 %v2665_v0 }
  0x31   :  { %2320 = vmatprep.subr.mxu0 %v2665_v0  ;;  %2312 = vmatpush3.msra.mxu1 %v2741_v5 }
  0x32   :  { %2321 = vmatpush3.msra.mxu0 %v179_v16  ;;  %2313 = vmatprep.subr.mxu1 %v2665_v0 }
  0x33   :  { %2322 = vmatprep.subr.mxu0 %v2665_v0  ;;  %2314 = vmatpush3.msra.mxu1 %v2743_v6 }
  0x34   :  { %2323 = vmatpush3.msra.mxu0 %v186_v18  ;;  %2315 = vmatprep.subr.mxu1 %v2665_v0 }
  0x35   :  { %2324 = vmatprep.subr.mxu0 %v2665_v0  ;;  %2316 = vmatpush3.msra.mxu1 %v2748_v9 }
  0x36   :  { %2317 = vmatprep.mubr.msk.f32.mxu1 %vm2666_vm0, %v2665_v0  ;;  %2325 = vmatpush3.msra.mxu0 %v193_v19 }
  0x37   :  { %2318 = vmatmul.mubr.f32.vlgmr.msra.gmra.mxu1 %v144_v22  ;;  %2326 = vmatprep.subr.mxu0 %v2665_v0 }
  0x38   :  { %2331 = vmatprep.subr.mxu1 %v2665_v0  ;;  %2327 = vmatpush3.msra.mxu0 %v200_v20 }
  0x39   :  { %2328 = vmatprep.mubr.msk.f32.mxu0 %vm2666_vm0, %v2665_v0  ;;  %2332 = vmatpush3.msra.mxu1 %v2739_v4  ;;  %v2948_v4 = vand.u32 4294901760, %v1057_v2 }
  0x3a   :  { %2329 = vmatmul.mubr.f32.vlgmr.msra.gmra.mxu0 %v2753_v12  ;;  %2333 = vmatprep.subr.mxu1 %v2665_v0 }
  0x3b   :  { %2342 = vmatprep.subr.mxu0 %v2665_v0  ;;  %2334 = vmatpush3.msra.mxu1 %v2741_v5  ;;  %v1056_v5 = vld [vmem:[#allocation5 + $0x8] sm:$0xff]  ;;  %v2954_v7 = vsub.f32 %v1057_v2, %v2948_v4 }
  0x3c   :  { %2343 = vmatpush3.msra.mxu0 %v2806_v36  ;;  %2335 = vmatprep.subr.mxu1 %v2665_v0  ;;  %v2956_v8 = vand.u32 4294901760, %v1056_v5 }
  0x3d   :  { %2344 = vmatprep.subr.mxu0 %v2665_v0  ;;  %2336 = vmatpush3.msra.mxu1 %v2743_v6  ;;  %v1175_v6 = vand.u32 4294901760, %v2946_v3  ;;  %v1182_v11 = vand.u32 4294901760, %v2954_v7 }
  0x3e   :  { %2345 = vmatpush3.msra.mxu0 %v2816_v39  ;;  %2337 = vmatprep.subr.mxu1 %v2665_v0 }
  0x3f   :  { %2346 = vmatprep.subr.mxu0 %v2665_v0  ;;  %2338 = vmatpush3.msra.mxu1 %v2748_v9  ;;  %v1055_v9 = vld [vmem:[#allocation5] sm:$0xff]  ;;  %v1176_v10 = vsub.f32 %v2946_v3, %v1175_v6  ;;  %v1183_v15 = vsub.f32 %v2954_v7, %v1182_v11 }
  0x40   :  { %2339 = vmatprep.mubr.msk.f32.mxu1 %vm2666_vm0, %v2665_v0  ;;  %2347 = vmatpush3.msra.mxu0 %v2827_v42  ;;  %v2967_v13 = vand.u32 4294901760, %v1055_v9 }
  0x41   :  { %2340 = vmatmul.mubr.f32.vlgmr.msra.gmra.mxu1 %v2753_v12  ;;  %2348 = vmatprep.subr.mxu0 %v2665_v0  ;;  %v2965_v12 = vsub.f32 %v1056_v5, %v2956_v8  ;;  %v1177_v14 = vand.u32 4294901760, %v1176_v10  ;;  %v1184_v18 = vand.u32 4294901760, %v1183_v15 }
  0x42   :  { %2353 = vmatprep.subr.mxu1 %v2665_v0  ;;  %2349 = vmatpush3.msra.mxu0 %v2840_v45  ;;  %v2976_v17 = vsub.f32 %v1055_v9, %v2967_v13 }
  0x43   :  { %2350 = vmatprep.mubr.msk.f32.mxu0 %vm2666_vm0, %v2665_v0  ;;  %2354 = vmatpush3.msra.mxu1 %v669_v56  ;;  %v1189_v16 = vand.u32 4294901760, %v2965_v12 }
  0x44   :  { %2351 = vmatmul.mubr.f32.vlgmr.msra.gmra.mxu0 %v634_v57  ;;  %2355 = vmatprep.subr.mxu1 %v2665_v0  ;;  %v1196_v20 = vand.u32 4294901760, %v2976_v17  ;;  %v2129_v57 = vld [vmem:[%s3260_s4] ss:$0 sm:$0xff] }
  0x45   :  { %2364 = vmatprep.subr.mxu0 %v2665_v0  ;;  %2356 = vmatpush3.msra.mxu1 %v676_v59  ;;  %v1190_v19 = vsub.f32 %v2965_v12, %v1189_v16 }
  0x46   :  { %2365 = vmatpush3.msra.mxu0 %v2825_v41  ;;  %2357 = vmatprep.subr.mxu1 %v2665_v0  ;;  %v1197_v22 = vsub.f32 %v2976_v17, %v1196_v20 }
  0x47   :  { %2366 = vmatprep.subr.mxu0 %v2665_v0  ;;  %2358 = vmatpush3.msra.mxu1 %v683_v61  ;;  %v1191_v21 = vand.u32 4294901760, %v1190_v19  ;;  %v1558_v19 = vld [vmem:[%s3263_s7 + $0x18] sm:$0xff] }
  0x48   :  { %2367 = vmatpush3.msra.mxu0 %v2838_v44  ;;  %2359 = vmatprep.subr.mxu1 %v2665_v0  ;;  %v1198_v23 = vand.u32 4294901760, %v1197_v22 }
  0x49   :  { %2368 = vmatprep.subr.mxu0 %v2665_v0  ;;  %2360 = vmatpush3.msra.mxu1 %v690_v62 }
  0x4a   :  { %2361 = vmatprep.mubr.msk.f32.mxu1 %vm2666_vm0, %v2665_v0  ;;  %2369 = vmatpush3.msra.mxu0 %v2847_v46 }
  0x4b   :  { %2362 = vmatmul.mubr.f32.vlgmr.msra.gmra.mxu1 %v2808_v37  ;;  %2370 = vmatprep.subr.mxu0 %v2665_v0 }
  0x4c   :  { %2375 = vmatprep.subr.mxu1 %v2665_v0  ;;  %2371 = vmatpush3.msra.mxu0 %v2858_v49 }
  0x4d   :  { %2372 = vmatprep.mubr.msk.f32.mxu0 %vm2666_vm0, %v2665_v0  ;;  %2376 = vmatpush3.msra.mxu1 %v2806_v36 }
  0x4e   :  { %2373 = vmatmul.mubr.f32.vlgmr.msra.gmra.mxu0 %v2830_v43  ;;  %2377 = vmatprep.subr.mxu1 %v2665_v0 }
  0x4f   :  { %2386 = vmatprep.subr.mxu0 %v2665_v0  ;;  %2378 = vmatpush3.msra.mxu1 %v2816_v39 }
  0x50   :  { %2387 = vmatpush3.msra.mxu0 %v667_v47  ;;  %2379 = vmatprep.subr.mxu1 %v2665_v0 }
  0x51   :  { %2388 = vmatprep.subr.mxu0 %v2665_v0  ;;  %2380 = vmatpush3.msra.mxu1 %v2827_v42 }
  0x52   :  { %2389 = vmatpush3.msra.mxu0 %v674_v50  ;;  %2381 = vmatprep.subr.mxu1 %v2665_v0 }
  0x53   :  { %2390 = vmatprep.subr.mxu0 %v2665_v0  ;;  %2382 = vmatpush3.msra.mxu1 %v2840_v45 }
  0x54   :  { %2383 = vmatprep.mubr.msk.f32.mxu1 %vm2666_vm0, %v2665_v0  ;;  %2391 = vmatpush3.msra.mxu0 %v681_v53 }
  0x55   :  { %2384 = vmatmul.mubr.f32.vlgmr.msra.gmra.mxu1 %v632_v48  ;;  %2392 = vmatprep.subr.mxu0 %v2665_v0 }
  0x56   :  { %2397 = vmatprep.subr.mxu1 %v2665_v0  ;;  %2393 = vmatpush3.msra.mxu0 %v688_v55 }
  0x57   :  { %2394 = vmatprep.mubr.msk.f32.mxu0 %vm2666_vm0, %v2665_v0  ;;  %2398 = vmatpush3.msra.mxu1 %v2806_v36 }
  0x58   :  { %2395 = vmatmul.mubr.f32.vlgmr.msra.gmra.mxu0 %v2808_v37  ;;  %2399 = vmatprep.subr.mxu1 %v2665_v0 }
  0x59   :  { %2405 = vmatprep.mubr.msk.f32.mxu1 %vm2666_vm0, %v2665_v0  ;;  %2400 = vmatpush3.msra.mxu1 %v2816_v39 }
  0x5a   :  { %2408 = vmatprep.subr.mxu0 %v2665_v0  ;;  %2401 = vmatprep.subr.mxu1 %v2665_v0 }
  0x5b   :  { %2416 = vmatprep.mubr.msk.f32.mxu0 %vm2666_vm0, %v2665_v0  ;;  %2402 = vmatpush3.msra.mxu1 %v2827_v42 }
  0x5c   :  { %2403 = vmatprep.subr.mxu1 %v2665_v0  ;;  %2409 = vmatpush3.msra.mxu0 %v2943_v1 }
  0x5d   :  { %2404 = vmatpush3.msra.mxu1 %v2840_v45  ;;  %2410 = vmatprep.subr.mxu0 %v2665_v0 }
  0x5e   :  { %2406 = vmatmul.mubr.f32.vlgmr.msra.gmra.mxu1 %v2808_v37  ;;  %2419 = vmatprep.subr.mxu1 %v2665_v0 }
  0x5f   :  { %2427 = vmatprep.mubr.msk.f32.mxu1 %vm2666_vm0, %v2665_v0  ;;  %2411 = vmatpush3.msra.mxu0 %v2948_v4 }
  0x60   :  { %2412 = vmatprep.subr.mxu0 %v2665_v0  ;;  %2420 = vmatpush3.msra.mxu1 %v1177_v14  ;;  %v1559_v14 = vld [vmem:[%s3263_s7 + $0x20] sm:$0xff] }
  0x61   :  { %2413 = vmatpush3.msra.mxu0 %v2956_v8  ;;  %2421 = vmatprep.subr.mxu1 %v2665_v0 }
  0x62   :  { %2414 = vmatprep.subr.mxu0 %v2665_v0  ;;  %2422 = vmatpush3.msra.mxu1 %v1184_v18  ;;  %v3079_v18 = vand.u32 4294901760, %v1559_v14 }
  0x63   :  { %2415 = vmatpush3.msra.mxu0 %v2967_v13  ;;  %2423 = vmatprep.subr.mxu1 %v2665_v0 }
  0x64   :  { %2430 = vmatprep.subr.mxu0 %v2665_v0  ;;  %2424 = vmatpush3.msra.mxu1 %v1191_v21 }
  0x65   :  { %2425 = vmatprep.subr.mxu1 %v2665_v0 }
  0x66   :  { %2426 = vmatpush3.msra.mxu1 %v1198_v23  ;;  %v3091_v23 = vsub.f32 %v1559_v14, %v3079_v18 }
  0x67   :  { %2441 = vmatprep.subr.mxu1 %v2665_v0 }
  0xe8   :  { %v148_v24 = vpop.f32.mrf.mxu0 }
  0xea   :  { %v2286_v25 = vpop.f32.mrf.mxu0 }
  0xeb   :  { %v1557_v25 = vld [vmem:[%s3263_s7 + $0x10] sm:$0xff] }
  0xec   :  { %v239_v26 = vpop.f32.mrf.mxu1 }
  0xed   :  { %v240_v35 = vadd.f32 %v239_v26, %v148_v24  ;;  %v3094_v24 = vand.u32 4294901760, %v1558_v19 }
  0xee   :  { %v2297_v27 = vpop.f32.mrf.mxu1 }
  0xf0   :  { %v319_v28 = vpop.f32.mrf.mxu0 }
  0xf1   :  { %v320_v38 = vadd.f32 %v319_v28, %v240_v35  ;;  %v1697_v28 = vand.u32 4294901760, %v3091_v23 }
  0xf2   :  { %v2308_v29 = vpop.f32.mrf.mxu0 }
  0xf3   :  { %v3104_v29 = vand.u32 4294901760, %v1557_v25 }
  0xf7   :  { %v396_v30 = vpop.f32.mrf.mxu1 }
  0xf8   :  { %v397_v40 = vadd.f32 %v396_v30, %v320_v38  ;;  %v3108_v30 = vsub.f32 %v1558_v19, %v3094_v24 }
  0xf9   :  { %v2319_v31 = vpop.f32.mrf.mxu1 }
  0xfa   :  { %v479_v32 = vpop.f32.mrf.mxu0  ;;  %v1556_v31 = vld [vmem:[%s3263_s7 + $0x8] sm:$0xff] }
  0xfb   :  { %v480_v42 = vadd.f32 %v479_v32, %v397_v40  ;;  %v3120_v35 = vand.u32 4294901760, %v1556_v31 }
  0xfc   :  { %v2330_v33 = vpop.f32.mrf.mxu0 }
  0xfd   :  { %v1698_v33 = vsub.f32 %v3091_v23, %v1697_v28  ;;  %v3131_v40 = vsub.f32 %v1556_v31, %v3120_v35 }
  0xff   :  { %v1699_v38 = vand.u32 4294901760, %v1698_v33 }
 0x101   :  { %v554_v34 = vpop.f32.mrf.mxu1 }
 0x102   :  { %v555_v44 = vadd.f32 %v554_v34, %v480_v42  ;;  %v3118_v34 = vsub.f32 %v1557_v25, %v3104_v29 }
 0x103   :  { %v2341_v36 = vpop.f32.mrf.mxu1 }
 0x104   :  { %v636_v37 = vpop.f32.mrf.mxu0  ;;  %v1704_v36 = vand.u32 4294901760, %v3108_v30 }
 0x105   :  { %v637_v47 = vadd.f32 %v636_v37, %v555_v44  ;;  %v1555_v37 = vld [vmem:[%s3263_s7] sm:$0xff]  ;;  %v1718_v44 = vand.u32 4294901760, %v3131_v40 }
 0x106   :  { %v2352_v39 = vpop.f32.mrf.mxu0  ;;  %v1705_v42 = vsub.f32 %v3108_v30, %v1704_v36 }
 0x107   :  { %v1711_v39 = vand.u32 4294901760, %v3118_v34 }
 0x10b   :  { %v727_v41 = vpop.f32.mrf.mxu1 }
 0x10c   :  { %v728_v48 = vadd.f32 %v727_v41, %v637_v47  ;;  %v3133_v41 = vand.u32 4294901760, %v1555_v37 }
 0x10d   :  { %v2363_v43 = vpop.f32.mrf.mxu1 }
 0x10e   :  { %v807_v45 = vpop.f32.mrf.mxu0  ;;  %v1712_v43 = vsub.f32 %v3118_v34, %v1711_v39 }
 0x10f   :  { %v808_v51 = vadd.f32 %v807_v45, %v728_v48  ;;  %v3146_v45 = vsub.f32 %v1555_v37, %v3133_v41  ;;  %v1719_v48 = vsub.f32 %v3131_v40, %v1718_v44 }
 0x110   :  { %v2374_v46 = vpop.f32.mrf.mxu0  ;;  %v1713_v47 = vand.u32 4294901760, %v1712_v43 }
 0x111   :  { %v1706_v46 = vand.u32 4294901760, %v1705_v42 }
 0x115   :  { %v884_v49 = vpop.f32.mrf.mxu1 }
 0x116   :  { %v885_v53 = vadd.f32 %v884_v49, %v808_v51  ;;  %v1725_v49 = vand.u32 4294901760, %v3146_v45 }
 0x117   :  { %v2385_v50 = vpop.f32.mrf.mxu1 }
 0x118   :  { %v967_v52 = vpop.f32.mrf.mxu0  ;;  %v1720_v50 = vand.u32 4294901760, %v1719_v48  ;;  %v1726_v51 = vsub.f32 %v3146_v45, %v1725_v49 }
 0x119   :  { %v968_v55 = vadd.f32 %v967_v52, %v885_v53 }
 0x11a   :  { %v2396_v54 = vpop.f32.mrf.mxu0  ;;  %v1727_v52 = vand.u32 4294901760, %v1726_v51 }
 0x11e   :  { %v1042_v56 = vpop.f32.mrf.mxu1 }
 0x11f   :  { %v1043_v58 = vadd.f32 %v1042_v56, %v968_v55 }
 0x120   :  { %v2407_v59 = vpop.f32.mrf.mxu1 }
 0x121   :  { %v1053_v60 = vadd.f32 %v2129_v57, %v1043_v58  ;;  %v2130_v59 = vld [vmem:[%s3262_s6] ss:$0 sm:$0xff] }
 0x123   :  { %v1054_v61 = vmax.f32 %v1053_v60, 0.0 }
 0x125   :  { %v1067_v62 = vsel %vm69_vm1, %v1054_v61, 0 }
 0x126   :  { %v1138_v63 = vand.u32 4294901760, %v1067_v62 }
 0x128   :  { %v1139_v2 = vsub.f32 %v1067_v62, %v1138_v63  ;;  %2428 = vmatmul.mubr.f32.vlgmr.msra.gmra.mxu1 %v1138_v63 }
 0x129   :  { %2442 = vmatpush3.msra.mxu1 %v2943_v1  ;;  %2449 = vmatprep.mubr.msk.f32.mxu1 %vm2666_vm0, %v2665_v0 }
 0x12a   :  { %2443 = vmatprep.subr.mxu1 %v2665_v0  ;;  %v1140_v5 = vand.u32 4294901760, %v1139_v2 }
 0x12b   :  { %2444 = vmatpush3.msra.mxu1 %v2948_v4 }
 0x12c   :  { %2445 = vmatprep.subr.mxu1 %v2665_v0  ;;  %v1141_v9 = vsub.f32 %v1139_v2, %v1140_v5 }
 0x12d   :  { %2446 = vmatpush3.msra.mxu1 %v2956_v8 }
 0x12e   :  { %2447 = vmatprep.subr.mxu1 %v2665_v0  ;;  %v1142_v10 = vand.u32 4294901760, %v1141_v9 }
 0x12f   :  { %2448 = vmatpush3.msra.mxu1 %v2967_v13 }
 0x130   :  { %2450 = vmatmul.mubr.f32.vlgmr.msra.gmra.mxu1 %v1140_v5  ;;  %2463 = vmatprep.subr.mxu1 %v2665_v0 }
 0x131   :  { %2417 = vmatmul.mubr.f32.vlgmr.msra.gmra.mxu0 %v1142_v10  ;;  %2464 = vmatpush3.msra.mxu1 %v2943_v1  ;;  %v1562_v1 = vld [vmem:[%s3263_s7 + $0x38] sm:$0xff] }
 0x132   :  { %2431 = vmatpush3.msra.mxu0 %v2946_v3  ;;  %2465 = vmatprep.subr.mxu1 %v2665_v0  ;;  %v3046_v3 = vand.u32 4294901760, %v1562_v1 }
 0x133   :  { %2432 = vmatprep.subr.mxu0 %v2665_v0  ;;  %2466 = vmatpush3.msra.mxu1 %v2948_v4  ;;  %v1561_v4 = vld [vmem:[%s3263_s7 + $0x30] sm:$0xff] }
 0x134   :  { %2433 = vmatpush3.msra.mxu0 %v2954_v7  ;;  %2467 = vmatprep.subr.mxu1 %v2665_v0  ;;  %v3054_v7 = vand.u32 4294901760, %v1561_v4 }
 0x135   :  { %2434 = vmatprep.subr.mxu0 %v2665_v0  ;;  %2468 = vmatpush3.msra.mxu1 %v2956_v8  ;;  %v1560_v8 = vld [vmem:[%s3263_s7 + $0x28] sm:$0xff] }
 0x136   :  { %2435 = vmatpush3.msra.mxu0 %v2965_v12  ;;  %2469 = vmatprep.subr.mxu1 %v2665_v0  ;;  %v3063_v12 = vsub.f32 %v1561_v4, %v3054_v7 }
 0x137   :  { %2436 = vmatprep.subr.mxu0 %v2665_v0  ;;  %2438 = vmatprep.mubr.msk.f32.mxu0 %vm2666_vm0, %v2665_v0 }
 0x138   :  { %2437 = vmatpush3.msra.mxu0 %v2976_v17  ;;  %2470 = vmatpush3.msra.mxu1 %v2967_v13  ;;  %v3065_v13 = vand.u32 4294901760, %v1560_v8 }
 0x139   :  { %2471 = vmatprep.mubr.msk.f32.mxu1 %vm2666_vm0, %v2665_v0  ;;  %2439 = vmatmul.mubr.f32.vlgmr.msra.gmra.mxu0 %v1139_v2 }
 0x13a   :  { %2452 = vmatprep.subr.mxu0 %v2665_v0  ;;  %2472 = vmatmul.mubr.f32.vlgmr.msra.gmra.mxu1 %v1138_v63  ;;  %v3077_v17 = vsub.f32 %v1560_v8, %v3065_v13 }
 0x13b   :  { %2453 = vmatpush3.msra.mxu0 %v1175_v6  ;;  %2460 = vmatprep.mubr.msk.f32.mxu0 %vm2666_vm0, %v2665_v0  ;;  %v3052_v6 = vsub.f32 %v1562_v1, %v3046_v3 }
 0x13c   :  { %2454 = vmatprep.subr.mxu0 %v2665_v0  ;;  %2493 = vmatprep.subr.mxu1 %v2665_v0  ;;  %v1690_v22 = vand.u32 4294901760, %v3077_v17 }
 0x13d   :  { %2455 = vmatpush3.msra.mxu0 %v1182_v11  ;;  %2509 = vmatprep.mubr.msk.f32.mxu1 %vm2666_vm0, %v2665_v0  ;;  %v1676_v11 = vand.u32 4294901760, %v3052_v6 }
 0x13e   :  { %2456 = vmatprep.subr.mxu0 %v2665_v0  ;;  %v1691_v27 = vsub.f32 %v3077_v17, %v1690_v22 }
 0x13f   :  { %2457 = vmatpush3.msra.mxu0 %v1189_v16  ;;  %v1677_v15 = vsub.f32 %v3052_v6, %v1676_v11  ;;  %v1683_v16 = vand.u32 4294901760, %v3063_v12 }
 0x140   :  { %2458 = vmatprep.subr.mxu0 %v2665_v0  ;;  %v1692_v32 = vand.u32 4294901760, %v1691_v27 }
 0x141   :  { %2459 = vmatpush3.msra.mxu0 %v1196_v20  ;;  %v1678_v20 = vand.u32 4294901760, %v1677_v15  ;;  %v1684_v21 = vsub.f32 %v3063_v12, %v1683_v16 }
 0x142   :  { %2461 = vmatmul.mubr.f32.vlgmr.msra.gmra.mxu0 %v1138_v63  ;;  %2474 = vmatprep.subr.mxu0 %v2665_v0 }
 0x143   :  { %2490 = vmatprep.mubr.msk.f32.mxu0 %vm2666_vm0, %v2665_v0  ;;  %2475 = vmatpush3.msra.mxu0 %v3046_v3  ;;  %v1685_v26 = vand.u32 4294901760, %v1684_v21 }
 0x144   :  { %2476 = vmatprep.subr.mxu0 %v2665_v0  ;;  %2494 = vmatpush3.msra.mxu1 %v1678_v20 }
 0x145   :  { %2477 = vmatpush3.msra.mxu0 %v3054_v7  ;;  %2495 = vmatprep.subr.mxu1 %v2665_v0 }
 0x146   :  { %2478 = vmatprep.subr.mxu0 %v2665_v0  ;;  %2496 = vmatpush3.msra.mxu1 %v1685_v26 }
 0x147   :  { %2479 = vmatpush3.msra.mxu0 %v3065_v13  ;;  %2497 = vmatprep.subr.mxu1 %v2665_v0 }
 0x148   :  { %2480 = vmatprep.subr.mxu0 %v2665_v0  ;;  %2498 = vmatpush3.msra.mxu1 %v1692_v32 }
 0x149   :  { %2481 = vmatpush3.msra.mxu0 %v3079_v18  ;;  %2499 = vmatprep.subr.mxu1 %v2665_v0 }
 0x14a   :  { %2482 = vmatprep.subr.mxu0 %v2665_v0  ;;  %2500 = vmatpush3.msra.mxu1 %v1699_v38 }
 0x14b   :  { %2483 = vmatpush3.msra.mxu0 %v3094_v24  ;;  %2501 = vmatprep.subr.mxu1 %v2665_v0 }
 0x14c   :  { %2484 = vmatprep.subr.mxu0 %v2665_v0  ;;  %2502 = vmatpush3.msra.mxu1 %v1706_v46 }
 0x14d   :  { %2485 = vmatpush3.msra.mxu0 %v3104_v29  ;;  %2503 = vmatprep.subr.mxu1 %v2665_v0 }
 0x14e   :  { %2486 = vmatprep.subr.mxu0 %v2665_v0  ;;  %2504 = vmatpush3.msra.mxu1 %v1713_v47 }
 0x14f   :  { %2487 = vmatpush3.msra.mxu0 %v3120_v35  ;;  %2505 = vmatprep.subr.mxu1 %v2665_v0 }
 0x150   :  { %2488 = vmatprep.subr.mxu0 %v2665_v0  ;;  %2506 = vmatpush3.msra.mxu1 %v1720_v50 }
 0x151   :  { %2489 = vmatpush3.msra.mxu0 %v3133_v41  ;;  %2507 = vmatprep.subr.mxu1 %v2665_v0 }
 0x152   :  { %2512 = vmatprep.subr.mxu0 %v2665_v0  ;;  %2508 = vmatpush3.msra.mxu1 %v1727_v52 }
 0x153   :  { %2531 = vmatprep.subr.mxu1 %v2665_v0 }
 0x1e8   :  { %v1235_v53 = vpop.f32.mrf.mxu1 }
 0x1ea   :  { %v2429_v54 = vpop.f32.mrf.mxu1 }
 0x1f0   :  { %v1392_v55 = vpop.f32.mrf.mxu1 }
 0x1f1   :  { %v1144_v56 = vpop.f32.mrf.mxu0 }
 0x1f2   :  { %v2451_v57 = vpop.f32.mrf.mxu1  ;;  %v1145_v60 = vadd.f32 %v2130_v59, %v1144_v56 }
 0x1f3   :  { %v2418_v58 = vpop.f32.mrf.mxu0 }
 0x1f4   :  { %v1236_v63 = vadd.f32 %v1235_v53, %v1145_v60 }
 0x1f9   :  { %v1315_v61 = vpop.f32.mrf.mxu0 }
 0x1fa   :  { %v1550_v62 = vpop.f32.mrf.mxu1  ;;  %v1316_v9 = vadd.f32 %v1315_v61, %v1236_v63 }
 0x1fb   :  { %v2440_v2 = vpop.f32.mrf.mxu0 }
 0x1fc   :  { %v2473_v5 = vpop.f32.mrf.mxu1  ;;  %v1393_v10 = vadd.f32 %v1392_v55, %v1316_v9 }
 0x202   :  { %v1475_v1 = vpop.f32.mrf.mxu0 }
 0x203   :  { %v1476_v4 = vadd.f32 %v1475_v1, %v1393_v10 }
 0x204   :  { %v2462_v8 = vpop.f32.mrf.mxu0 }
 0x205   :  { %v1551_v14 = vadd.f32 %v1550_v62, %v1476_v4 }
 0x207   :  { %v1554_v15 = vmax.f32 %v1551_v14, 0.0 }
 0x209   :  { %v1572_v19 = vsel %vm1570_vm2, %v1554_v15, 0 }
 0x20a   :  { %v3166_v20 = vand.u32 4294901760, %v1572_v19 }
 0x20c   :  { %v1648_v21 = vsub.f32 %v1572_v19, %v3166_v20  ;;  %2510 = vmatmul.mubr.f32.vlgmr.msra.gmra.mxu1 %v3166_v20 }
 0x20d   :  { %2532 = vmatpush3.msra.mxu1 %v3046_v3  ;;  %2547 = vmatprep.mubr.msk.f32.mxu1 %vm2666_vm0, %v2665_v0 }
 0x20e   :  { %2533 = vmatprep.subr.mxu1 %v2665_v0  ;;  %v1649_v25 = vand.u32 4294901760, %v1648_v21 }
 0x20f   :  { %2534 = vmatpush3.msra.mxu1 %v3054_v7 }
 0x210   :  { %2535 = vmatprep.subr.mxu1 %v2665_v0  ;;  %v1650_v26 = vsub.f32 %v1648_v21, %v1649_v25 }
 0x211   :  { %2536 = vmatpush3.msra.mxu1 %v3065_v13 }
 0x212   :  { %2537 = vmatprep.subr.mxu1 %v2665_v0  ;;  %v1651_v27 = vand.u32 4294901760, %v1650_v26 }
 0x213   :  { %2538 = vmatpush3.msra.mxu1 %v3079_v18 }
 0x214   :  { %2539 = vmatprep.subr.mxu1 %v2665_v0  ;;  %2491 = vmatmul.mubr.f32.vlgmr.msra.gmra.mxu0 %v1651_v27 }
 0x215   :  { %2513 = vmatpush3.msra.mxu0 %v3052_v6  ;;  %2540 = vmatpush3.msra.mxu1 %v3094_v24 }
 0x216   :  { %2514 = vmatprep.subr.mxu0 %v2665_v0  ;;  %2541 = vmatprep.subr.mxu1 %v2665_v0 }
 0x217   :  { %2515 = vmatpush3.msra.mxu0 %v3063_v12  ;;  %2542 = vmatpush3.msra.mxu1 %v3104_v29 }
 0x218   :  { %2516 = vmatprep.subr.mxu0 %v2665_v0  ;;  %2543 = vmatprep.subr.mxu1 %v2665_v0 }
 0x219   :  { %2517 = vmatpush3.msra.mxu0 %v3077_v17  ;;  %2544 = vmatpush3.msra.mxu1 %v3120_v35 }
 0x21a   :  { %2518 = vmatprep.subr.mxu0 %v2665_v0  ;;  %2545 = vmatprep.subr.mxu1 %v2665_v0 }
 0x21b   :  { %2519 = vmatpush3.msra.mxu0 %v3091_v23  ;;  %2546 = vmatpush3.msra.mxu1 %v3133_v41 }
 0x21c   :  { %2520 = vmatprep.subr.mxu0 %v2665_v0  ;;  %2548 = vmatmul.mubr.f32.vlgmr.msra.gmra.mxu1 %v1649_v25 }
 0x21d   :  { %2569 = vmatprep.subr.mxu1 %v2665_v0  ;;  %2521 = vmatpush3.msra.mxu0 %v3108_v30 }
 0x21e   :  { %2570 = vmatpush3.msra.mxu1 %v3046_v3  ;;  %2522 = vmatprep.subr.mxu0 %v2665_v0 }
 0x21f   :  { %2571 = vmatprep.subr.mxu1 %v2665_v0  ;;  %2523 = vmatpush3.msra.mxu0 %v3118_v34 }
 0x220   :  { %2572 = vmatpush3.msra.mxu1 %v3054_v7  ;;  %2524 = vmatprep.subr.mxu0 %v2665_v0 }
 0x221   :  { %2573 = vmatprep.subr.mxu1 %v2665_v0  ;;  %2525 = vmatpush3.msra.mxu0 %v3131_v40 }
 0x222   :  { %2574 = vmatpush3.msra.mxu1 %v3065_v13  ;;  %2526 = vmatprep.subr.mxu0 %v2665_v0 }
 0x223   :  { %2575 = vmatprep.subr.mxu1 %v2665_v0  ;;  %2527 = vmatpush3.msra.mxu0 %v3146_v45 }
 0x224   :  { %2528 = vmatprep.mubr.msk.f32.mxu0 %vm2666_vm0, %v2665_v0  ;;  %2576 = vmatpush3.msra.mxu1 %v3079_v18  ;;  %v2131_v18 = vld [vmem:[%s3264_s8] ss:$0 sm:$0xff] }
 0x225   :  { %2529 = vmatmul.mubr.f32.vlgmr.msra.gmra.mxu0 %v1648_v21  ;;  %2550 = vmatprep.subr.mxu0 %v2665_v0 }
 0x226   :  { %2577 = vmatprep.subr.mxu1 %v2665_v0  ;;  %2551 = vmatpush3.msra.mxu0 %v1676_v11 }
 0x227   :  { %2578 = vmatpush3.msra.mxu1 %v3094_v24  ;;  %2552 = vmatprep.subr.mxu0 %v2665_v0 }
 0x228   :  { %2579 = vmatprep.subr.mxu1 %v2665_v0  ;;  %2553 = vmatpush3.msra.mxu0 %v1683_v16 }
 0x229   :  { %2580 = vmatpush3.msra.mxu1 %v3104_v29  ;;  %2554 = vmatprep.subr.mxu0 %v2665_v0 }
 0x22a   :  { %2581 = vmatprep.subr.mxu1 %v2665_v0  ;;  %2555 = vmatpush3.msra.mxu0 %v1690_v22 }
 0x22b   :  { %2582 = vmatpush3.msra.mxu1 %v3120_v35  ;;  %2556 = vmatprep.subr.mxu0 %v2665_v0 }
 0x22c   :  { %2583 = vmatprep.subr.mxu1 %v2665_v0  ;;  %2557 = vmatpush3.msra.mxu0 %v1697_v28 }
 0x22d   :  { %2584 = vmatpush3.msra.mxu1 %v3133_v41  ;;  %2585 = vmatprep.mubr.msk.f32.mxu1 %vm2666_vm0, %v2665_v0 }
 0x22e   :  { %2558 = vmatprep.subr.mxu0 %v2665_v0  ;;  %2586 = vmatmul.mubr.f32.vlgmr.msra.gmra.mxu1 %v3166_v20 }
 0x22f   :  { %2559 = vmatpush3.msra.mxu0 %v1704_v36  ;;  %2566 = vmatprep.mubr.msk.f32.mxu0 %vm2666_vm0, %v2665_v0 }
 0x230   :  { %2560 = vmatprep.subr.mxu0 %v2665_v0 }
 0x231   :  { %2561 = vmatpush3.msra.mxu0 %v1711_v39 }
 0x232   :  { %2562 = vmatprep.subr.mxu0 %v2665_v0 }
 0x233   :  { %2563 = vmatpush3.msra.mxu0 %v1718_v44 }
 0x234   :  { %2564 = vmatprep.subr.mxu0 %v2665_v0 }
 0x235   :  { %2565 = vmatpush3.msra.mxu0 %v1725_v49 }
 0x236   :  { %2567 = vmatmul.mubr.f32.vlgmr.msra.gmra.mxu0 %v3166_v20 }
 0x2cc   :  { %v1764_v3 = vpop.f32.mrf.mxu1 }
 0x2ce   :  { %v2511_v6 = vpop.f32.mrf.mxu1 }
 0x2d4   :  { %v1653_v7 = vpop.f32.mrf.mxu0 }
 0x2d5   :  { %v1654_v22 = vadd.f32 %v2131_v18, %v1653_v7 }
 0x2d6   :  { %v2492_v11 = vpop.f32.mrf.mxu0 }
 0x2d7   :  { %v1765_v0 = vadd.f32 %v1764_v3, %v1654_v22 }
 0x2dc   :  { %v1933_v12 = vpop.f32.mrf.mxu1 }
 0x2de   :  { %v2549_v13 = vpop.f32.mrf.mxu1 }
 0x2e5   :  { %v1852_v16 = vpop.f32.mrf.mxu0 }
 0x2e6   :  { %v1853_v28 = vadd.f32 %v1852_v16, %v1765_v0 }
 0x2e7   :  { %v2530_v17 = vpop.f32.mrf.mxu0 }
 0x2e8   :  { %v1934_v29 = vadd.f32 %v1933_v12, %v1853_v28 }
 0x2ee   :  { %v2107_v23 = vpop.f32.mrf.mxu1 }
 0x2f0   :  { %v2587_v24 = vpop.f32.mrf.mxu1 }
 0x2f6   :  { %v2028_v30 = vpop.f32.mrf.mxu0 }
 0x2f7   :  { %v2029_v31 = vadd.f32 %v2028_v30, %v1934_v29 }
 0x2f8   :  { %v2568_v32 = vpop.f32.mrf.mxu0 }
 0x2f9   :  { %v2108_v33 = vadd.f32 %v2107_v23, %v2029_v31 }
 0x2fb   :  { %2112 = vst.msk [vmem:[#allocation7] sm:$0xff] %vm2111_vm3, %v2108_v33 }
 0x2fc   :  { %2646 = shalt.err (!%p2643_p0)
}
 0x2fd   :  { %2122 = dma.vmem_to_hbm [thread:$0]  %s2120_s0, 128, %s3265_s9, [#allocation4]  }
 0x2fe   :  { %2659 = dma.done.wait [#allocation4], 128  }
 0x2ff   :  { %2660 = vsyncadd [#allocation4], 4294967168 }
 0x300   :  { %2126 = vsyncpa [#allocation3], 1 }
 0x301   :  { %2127 = vsyncpa [#allocation6], 1 }
 0x302   :  { %2128 = vsyncpa [#allocation4], 1 }

</bundles_post_ra>
